<compile_context>
chip_gen: v7x
topology: tpu7x:2x2x1
jax: 0.10.0
libtpu: 0.0.40
codegen_flags: <defaults>
</compile_context>

<pallas_src>
import functools

import jax
import jax.numpy as jnp
from jax.experimental import pallas as pl
from jax.experimental.pallas import tpu as pltpu

# ------------------------- configuration (small) ----------------------------
NUM_CLASSES = 21
N_BLOCKS = 2
BATCH = 2
IMG_SIZE = 32
PATCH_SIZE = 4
NUM_PATCHES = (IMG_SIZE // PATCH_SIZE) ** 2          # 64
EMBED_DIM = 64
N_TOKENS = 1 + NUM_PATCHES                            # CLS + patches = 65

_LANES = 128


# --------------------------- kernel 1: features -----------------------------
def _feat_mean_kernel(f_ref, o_ref):
    # f_ref: (n_blocks, tile_rows, lanes).  Elementwise mean over the leading
    # block axis (pure VPU adds across vregs), f32 accumulate, lane-dense
    # unmasked store of the (tile_rows, lanes) tile.
    f = f_ref[...].astype(jnp.float32)
    o_ref[...] = jnp.mean(f, axis=0)


def extract_feature(intermediate_feats, *, tile_rows=1024):
    """intermediate_feats: (n_blocks, B, 1+N, D) -> (B*N, D) float32.

    Mean over blocks, drop CLS token, flatten(start_dim=0, end_dim=1).
    The kernel averages ALL tokens (incl. CLS, ~1/T wasted compute) so the
    expensive pre-kernel HBM slice copy of the full activation is avoided;
    the CLS drop happens on the n_blocks-times-smaller reduced output.
    """
    nblk, b, t, d = intermediate_feats.shape
    flat = b * t * d
    if flat % _LANES == 0:
        lanes = _LANES                                # lane-dense fast path
    else:
        # fallback: keep D on lanes (masked stores if D < 128); production
        # ViT dims (D multiple of 128) always take the fast path above.
        lanes = d
    rows = flat // lanes
    x = intermediate_feats.reshape(nblk, rows, lanes)  # free flatten, no copy

    tr = min(tile_rows, rows)
    grid = (pl.cdiv(rows, tr),)
    # VMEM per step: 2 bufs * nblk * tr * lanes * dtype  (+ 2 * out tile)
    # -> a few MiB at tr=1024, comfortably under v5e's 16 MiB scoped default
    # and v7x's 32 MiB scoped / 64 MiB physical budget.
    out = pl.pallas_call(
        _feat_mean_kernel,
        out_shape=jax.ShapeDtypeStruct((rows, lanes), jnp.float32),
        grid=grid,
        in_specs=[pl.BlockSpec((nblk, tr, lanes), lambda i: (0, i, 0))],
        out_specs=pl.BlockSpec((tr, lanes), lambda i: (i, 0)),
        compiler_params=pltpu.CompilerParams(
            dimension_semantics=("parallel",)),
    )(intermediate_feats.reshape(nblk, rows, lanes) if x is None else x)

    # glue (cheap, on the reduced output): undo flatten, drop CLS, re-flatten.
    feat = out.reshape(b, t, d)[:, 1:, :]
    return feat.reshape(b * (t - 1), d)


# ---------------------- kernel 2: coarse patch labels ------------------------
def _patch_majority_kernel(p_ref, o_ref, *, num_classes):
    # p_ref: (P2, tile_m) int8 — pixels on sublanes, patches on lanes.
    # Loop over classes (21) instead of pixels (P2): each iteration is a
    # lane-parallel compare + sublane sum + running-max/select.  Ties break to
    # the lowest class index (strict '>'), matching argmax first-max semantics.
    # Pixel values >= num_classes are ignored (never counted).
    x = p_ref[...].astype(jnp.int32)                   # widen once in-register
    best_cnt = jnp.sum((x == 0).astype(jnp.int32), axis=0, keepdims=True)
    best_cls = jnp.zeros_like(best_cnt)
    for c in range(1, num_classes):                    # small, unrolled
        cnt = jnp.sum((x == c).astype(jnp.int32), axis=0, keepdims=True)
        take = cnt > best_cnt
        best_cls = jnp.where(take, c, best_cls)
        best_cnt = jnp.where(take, cnt, best_cnt)
    o_ref[...] = best_cls[None]                        # (1, 1, tile_m) lane-dense


def _unfold_mask_t(mask, patch_size):
    """Transposed nn.Unfold: (B, H, W) -> (patch_size**2, B*num_patches).

    Row-major patch ordering on the second axis and row-major pixel ordering
    within a patch on the first axis (exactly nn.Unfold's layout, transposed).
    """
    b, h, w = mask.shape
    hp, wp = h // patch_size, w // patch_size
    x = mask.reshape(b, hp, patch_size, wp, patch_size)
    x = jnp.transpose(x, (2, 4, 0, 1, 3))              # (P, P, B, hp, wp)
    return x.reshape(patch_size * patch_size, b * hp * wp)


def _unfold_mask_rowmajor(mask, patch_size):
    """Reference-only helper: nn.Unfold + permute(0,2,1), flattened to (M, P2)."""
    b, h, w = mask.shape
    hp, wp = h // patch_size, w // patch_size
    x = mask.reshape(b, hp, patch_size, wp, patch_size)
    x = jnp.transpose(x, (0, 1, 3, 2, 4))
    return x.reshape(b * hp * wp, patch_size * patch_size).astype(jnp.int32)


def mask_to_patches(mask, patch_size=PATCH_SIZE, num_classes=NUM_CLASSES):
    """mask: (B, H, W) int labels -> (B*num_patches, patch_size**2) uint8."""
    # carry the mask as int8 end-to-end (classes < 21 fit); 4x less HBM/VMEM.
    patches_t = _unfold_mask_t(mask.astype(jnp.int8), patch_size)  # (P2, M)
    p2, m = patches_t.shape

    # pad patch count to a multiple of the lane tile; padded lanes vote class 0
    # and are sliced off below.
    m_pad = ((m + _LANES - 1) // _LANES) * _LANES
    tile_m = min(2048, m_pad)
    m_pad = ((m + tile_m - 1) // tile_m) * tile_m
    if m_pad > m:
        patches_t = jnp.pad(patches_t, ((0, 0), (0, m_pad - m)))
    grid_m = m_pad // tile_m

    cls = pl.pallas_call(
        functools.partial(_patch_majority_kernel, num_classes=num_classes),
        out_shape=jax.ShapeDtypeStruct((grid_m, 1, tile_m), jnp.int32),
        grid=(grid_m,),
        in_specs=[pl.BlockSpec((p2, tile_m), lambda i: (0, i))],
        out_specs=pl.BlockSpec((1, 1, tile_m), lambda i: (i, 0, 0)),
        compiler_params=pltpu.CompilerParams(
            dimension_semantics=("parallel",)),
    )(patches_t)

    cls = cls.reshape(m_pad)[:m]                       # (M,) winning classes
    # expand(-1, num_patches, patch_size**2) + .byte() done in XLA: avoids
    # storing P2-fold redundant int32 through the kernel.
    return jnp.broadcast_to(cls[:, None], (m, p2)).astype(jnp.uint8)


# --------------------------------- main --------------------------------------
if __name__ == "__main__":
    key = jax.random.PRNGKey(0)
    k_feat, k_mask = jax.random.split(key)

    # synthetic backbone intermediate outputs: (n_blocks, B, 1+N, D)
    feats = jax.random.normal(
        k_feat, (N_BLOCKS, BATCH, N_TOKENS, EMBED_DIM), dtype=jnp.float32)
    # synthetic segmentation target mask: (B, H, W) class labels
    mask = jax.random.randint(
        k_mask, (BATCH, IMG_SIZE, IMG_SIZE), 0, NUM_CLASSES, dtype=jnp.int32)

    feat_out = jax.block_until_ready(extract_feature(feats))
    label_out = jax.block_until_ready(mask_to_patches(mask))

    # lightweight correctness checks against plain-JAX references
    ref_feat = jnp.mean(feats.astype(jnp.float32), axis=0)[:, 1:, :]
    ref_feat = ref_feat.reshape(BATCH * NUM_PATCHES, EMBED_DIM)
    assert feat_out.shape == ref_feat.shape, "feature shape mismatch"
    assert jnp.allclose(feat_out, ref_feat, atol=1e-5), "feature mismatch"

    patches = _unfold_mask_rowmajor(mask, PATCH_SIZE)          # (M, P2)
    hist = jnp.sum(jax.nn.one_hot(patches, NUM_CLASSES, dtype=jnp.int32), axis=1)
    ref_lab = jnp.argmax(hist, axis=-1).astype(jnp.uint8)
    ref_lab = jnp.broadcast_to(ref_lab[:, None], label_out.shape)
    assert jnp.array_equal(label_out, ref_lab), "patch-label mismatch"

    assert feat_out.shape == (BATCH * NUM_PATCHES, EMBED_DIM)
    assert label_out.shape == (BATCH * NUM_PATCHES, PATCH_SIZE * PATCH_SIZE)
    assert label_out.dtype == jnp.uint8

    print("KERNEL_OK")
</pallas_src>

<mosaic_0001>
module attributes {stable_mosaic.version = 11 : i64} {
  func.func @_feat_mean_kernel(%arg0: i32, %arg1: memref<2x65x128xf32, #tpu.memory_space<vmem>>, %arg2: memref<65x128xf32, #tpu.memory_space<vmem>>) attributes {dimension_semantics = [#tpu.dimension_semantics<parallel>], iteration_bounds = array<i64: 1>, scalar_prefetch = 0 : i64, scratch_operands = 0 : i64, tpu.core_type = #tpu.core_type<tc>, window_params = [{transform_indices = @transform_0, window_bounds = array<i64: 2, 65, 128>}, {transform_indices = @transform_1, window_bounds = array<i64: 65, 128>}]} {
    %c0 = arith.constant 0 : index
    %c0_0 = arith.constant 0 : index
    %c0_1 = arith.constant 0 : index
    %0 = vector.load %arg1[%c0, %c0_0, %c0_1] : memref<2x65x128xf32, #tpu.memory_space<vmem>>, vector<2x65x128xf32>
    %cst = arith.constant dense<0.000000e+00> : vector<65x128xf32>
    %1 = vector.multi_reduction <add>, %0, %cst [0] : vector<2x65x128xf32> to vector<65x128xf32>
    %cst_2 = arith.constant 2.000000e+00 : f32
    %2 = vector.broadcast %cst_2 : f32 to vector<65x128xf32>
    %3 = arith.divf %1, %2 : vector<65x128xf32>
    %c0_3 = arith.constant 0 : index
    %c0_4 = arith.constant 0 : index
    %4 = vector.load %arg2[%c0_3, %c0_4] : memref<65x128xf32, #tpu.memory_space<vmem>>, vector<65x128xf32>
    tpu.vector_store %arg2[%c0_3, %c0_4], %3 {strides = array<i32>} : memref<65x128xf32, #tpu.memory_space<vmem>>, vector<65x128xf32>,
    return
  }
  func.func @transform_0(%arg0: i32) -> (i32, i32, i32) {
    %c0_i32 = arith.constant 0 : i32
    %c0_i32_0 = arith.constant 0 : i32
    %c0_i32_1 = arith.constant 0 : i32
    return %c0_i32, %arg0, %c0_i32_0 : i32, i32, i32
  }
  func.func @transform_1(%arg0: i32) -> (i32, i32) {
    %c0_i32 = arith.constant 0 : i32
    %c0_i32_0 = arith.constant 0 : i32
    return %arg0, %c0_i32 : i32, i32
  }
}

</mosaic_0001>

<bundles_post_ra>
// kernel: tpu_custom_call.1
= control target key start
LH: loop header
LB: loop body
LE: loop exit
PB: predicated region body
PF: predicated region fallthrough
CT: control target
= control target key end

     0   :  { %vm35_vm0 = vcmask 1040384   ;;  %s182_s0 = inlined_call_operand.vmem [shape: f32[2,65,128], index: 0, kind: input, shape index: {}]   ;;  %s183_s1 = inlined_call_operand.hbm [shape: f32[65,128], index: 1, kind: output, shape index: {}]  }
   0x1   :  { %v9_v0 = vld [vmem:[%s182_s0] sm:$0xff]  ;;  %v18_v1 = vld [vmem:[%s182_s0 + $0x48] sm:$0xff]  ;;  %v19_v4 = vld [vmem:[%s182_s0 + $0x50] sm:$0xff] }
   0x2   :  { %v10_v2 = vld [vmem:[%s182_s0 + $0x8] sm:$0xff]  ;;  %v27_v3 = vadd.f32 %v18_v1, %v9_v0  ;;  %v11_v5 = vld [vmem:[%s182_s0 + $0x10] sm:$0xff]  ;;  %v20_v6 = vld [vmem:[%s182_s0 + $0x58] sm:$0xff] }
   0x3   :  { %v28_v7 = vadd.f32 %v19_v4, %v10_v2  ;;  %v29_v8 = vadd.f32 %v20_v6, %v11_v5  ;;  %v12_v9 = vld [vmem:[%s182_s0 + $0x18] sm:$0xff]  ;;  %v21_v10 = vld [vmem:[%s182_s0 + $0x60] sm:$0xff]  ;;  %v22_v14 = vld [vmem:[%s182_s0 + $0x68] sm:$0xff] }
   0x4   :  { %v13_v11 = vld [vmem:[%s182_s0 + $0x20] sm:$0xff]  ;;  %v40_v12 = vmul.f32 0.5, %v27_v3  ;;  %v30_v13 = vadd.f32 %v21_v10, %v12_v9  ;;  %v14_v15 = vld [vmem:[%s182_s0 + $0x28] sm:$0xff]  ;;  %v23_v16 = vld [vmem:[%s182_s0 + $0x70] sm:$0xff] }
   0x5   :  { %v41_v17 = vmul.f32 0.5, %v28_v7  ;;  %v42_v18 = vmul.f32 0.5, %v29_v8  ;;  %v31_v19 = vadd.f32 %v22_v14, %v13_v11  ;;  %v32_v20 = vadd.f32 %v23_v16, %v14_v15  ;;  %v15_v21 = vld [vmem:[%s182_s0 + $0x30] sm:$0xff]  ;;  %v24_v22 = vld [vmem:[%s182_s0 + $0x78] sm:$0xff]  ;;  %v25_v26 = vld [vmem:[%s182_s0 + $0x80] sm:$0xff] }
   0x6   :  { %v16_v23 = vld [vmem:[%s182_s0 + $0x38] sm:$0xff]  ;;  %49 = vst [vmem:[#allocation2] sm:$0xff] %v40_v12  ;;  %v43_v24 = vmul.f32 0.5, %v30_v13  ;;  %v33_v25 = vadd.f32 %v24_v22, %v15_v21  ;;  %v17_v27 = vld [vmem:[%s182_s0 + $0x40] sm:$0x1] }
   0x7   :  { %v26_v28 = vld [vmem:[%s182_s0 + $0x88] sm:$0x1]  ;;  %50 = vst [vmem:[#allocation2 + $0x8] sm:$0xff] %v41_v17  ;;  %51 = vst [vmem:[#allocation2 + $0x10] sm:$0xff] %v42_v18  ;;  %v44_v29 = vmul.f32 0.5, %v31_v19  ;;  %v45_v30 = vmul.f32 0.5, %v32_v20  ;;  %v34_v31 = vadd.f32 %v25_v26, %v16_v23 }
   0x8   :  { %v36_v32 = vsel %vm35_vm0, %v17_v27, 0.0 }
   0x9   :  { %6 = vsyncpa [#allocation3], 0  ;;  %52 = vst [vmem:[#allocation2 + $0x18] sm:$0xff] %v43_v24  ;;  %v46_v33 = vmul.f32 0.5, %v33_v25  ;;  %v37_v34 = vsel %vm35_vm0, %v26_v28, 0.0  ;;  %s101_s13 = smov [#allocation2]  }
   0xa   :  { %s63_s14 = sshll.u32 %s101_s13, 4  ;;  %53 = vst [vmem:[#allocation2 + $0x20] sm:$0xff] %v44_v29  ;;  %54 = vst [vmem:[#allocation2 + $0x28] sm:$0xff] %v45_v30  ;;  %v47_v35 = vmul.f32 0.5, %v34_v31  ;;  %v38_v36 = vadd.f32 %v37_v34, %v36_v32  ;;  %s64_s14 = int_to_ptr.vmem [resolvable:$true] %s63_s14 }
   0xb   :  { %55 = vst [vmem:[#allocation2 + $0x30] sm:$0xff] %v46_v33  ;;  %s77_s0 = scalar_lea.vmem %s64_s14, 1152  ;;  %p82_p1 = scmp.lt.s32.totalorder %s64_s14, %s64_s14 }
   0xc   :  { %56 = vst [vmem:[#allocation2 + $0x38] sm:$0xff] %v47_v35  ;;  %v48_v37 = vmul.f32 0.5, %v38_v36  ;;  %p78_p0 = scmp.ne.s32.totalorder %s64_s14, %s77_s0  ;;  %p83_p2 = scmp.lt.s32.totalorder %s77_s0, %s77_s0 }
   0xe   :  { %57 = vst [vmem:[#allocation2 + $0x40] sm:$0x1] %v48_v37  ;;  %p84_p3 = por %p83_p2, %p82_p1 }
  0x10   :  { %p85_p4 = pnand %p84_p3, %p78_p0 }
  0x12   :  { %88 = shalt.err (!%p85_p4)
}
  0x13   :  { %s89_s17 = scalar_lea.hbm %s183_s1, 1152 }
  0x14   :  { %p90_p5 = scmp.ne.s32.totalorder %s183_s1, %s89_s17  ;;  %p93_p6 = scmp.lt.u32.totalorder %s89_s17, %s183_s1 }
  0x16   :  { %p95_p7 = pnand %p93_p6, %p90_p5 }
  0x18   :  { %98 = shalt.err (!%p95_p7)
}
  0x19   :  { %s102_s22 = smov 128   ;;  %s103_s23 = smov 8  }
  0x1a   :  { %69 = dma.vmem_to_hbm [thread:$0]  %s64_s14, 1152, %s183_s1, [#allocation3], %s102_s22, %s102_s22, %s103_s23  }
  0x1b   :  { %99 = dma.done.wait [#allocation3], 1152  }
  0x1c   :  { %100 = vsyncadd [#allocation3], 4294966144 }
  0x1d   :  { %73 = vsyncpa [#allocation3], 1 }

</bundles_post_ra>
